<compile_context>
chip_gen: v5e
topology: v5e:2x2
jax: 0.10.0
libtpu: 0.0.40
codegen_flags: <defaults>
</compile_context>

<pallas_src>
import functools

import jax
import jax.numpy as jnp
from jax.experimental import pallas as pl
from jax.experimental.pallas import tpu as pltpu

_LANE = 128
_SUBLANE = 8


def _round_up(n, m):
    return ((n + m - 1) // m) * m


def _cnn_kernel(x_ref, wc_ref, bc_ref, w12_ref, b12_ref, o_ref):
    # x_ref:   (TB, C)        input rows (L=1 squeezed)
    # wc_ref:  (C, Hp)        Conv1d(kernel_size=1) weight, transposed, H padded to 128
    # bc_ref:  (1, Hp)        Conv1d bias (zero-padded)
    # w12_ref: (Hp, Op)       fused Linear(H,10) @ Linear(10,O), zero-padded
    # b12_ref: (1, Op)        fused bias (zero-padded)
    # o_ref:   (TB, Op)       output tile (Op = round_up(O, 8))
    h = jnp.dot(x_ref[...], wc_ref[...],
                preferred_element_type=jnp.float32) + bc_ref[...]
    h = h * h                                            # Square activation (VPU, f32)
    y = jnp.dot(h, w12_ref[...],
                preferred_element_type=jnp.float32) + b12_ref[...]
    o_ref[...] = y.astype(o_ref.dtype)


def prepare_params(params):
    """One-time weight preprocessing: transpose, fuse the two Linears, pad.

    Call once and reuse; keeps all reshapes/transposes/pads out of the
    per-forward hot path.  All padding is with zeros, hence exact.
    """
    wc, bc, w1, b1, w2, b2 = params
    H, C = wc.shape[0], wc.shape[1]
    O = w2.shape[0]
    H_pad = _round_up(H, _LANE)      # lane-dense hidden dim
    O_pad = _round_up(O, _SUBLANE)   # small output padding (was 128 -> HBM waste)

    wc_t = jnp.asarray(wc, jnp.float32)[:, :, 0].T            # (C, H)
    bc_r = jnp.asarray(bc, jnp.float32).reshape(1, H)         # (1, H)

    # No nonlinearity between the two Linear layers, so fold them:
    #   y = (h @ w1.T + b1) @ w2.T + b2 = h @ (w1.T @ w2.T) + (b1 @ w2.T + b2)
    w1_t = jnp.asarray(w1, jnp.float32).T                     # (H, 10)
    w2_t = jnp.asarray(w2, jnp.float32).T                     # (10, O)
    w12 = w1_t @ w2_t                                         # (H, O)
    b12 = jnp.asarray(b1, jnp.float32) @ w2_t + jnp.asarray(b2, jnp.float32)

    wc_tp = jnp.pad(wc_t, ((0, 0), (0, H_pad - H)))           # (C, Hp)
    bc_rp = jnp.pad(bc_r, ((0, 0), (0, H_pad - H)))           # (1, Hp)
    w12_p = jnp.pad(w12, ((0, H_pad - H), (0, O_pad - O)))    # (Hp, Op)
    b12_p = jnp.pad(b12, (0, O_pad - O)).reshape(1, O_pad)    # (1, Op)

    return (wc_tp, bc_rp, w12_p, b12_p, O)


@functools.partial(jax.jit, static_argnames=("out_size",))
def _forward_impl(x, wc_t, bc_r, w12_p, b12_p, *, out_size):
    B = x.shape[0]
    C, H_pad = wc_t.shape
    O_pad = w12_p.shape[1]

    x2d = x[:, :, 0]                                          # (B, C), L == 1

    # Batch tile: large enough that the ~0.35 us per-grid-step overhead is
    # amortized, but split into >= 2 tiles for mid/large B so v7x's two
    # TensorCores both get work ("parallel" grid axis).  Even TB=2048 with
    # O_pad=8 is only ~200 KB of double-buffered VMEM -- far below any
    # generation's VMEM limit.
    if B <= 2 * _SUBLANE:
        TB = _round_up(B, _SUBLANE)
    else:
        TB = min(2048, _round_up(pl.cdiv(B, 2), _SUBLANE))
    grid = (pl.cdiv(B, TB),)   # ragged last block: OOB rows dropped by Pallas

    flops = 2 * B * (C * H_pad + H_pad * O_pad) + 3 * B * H_pad
    bytes_accessed = 4 * (B * C + B * O_pad
                          + C * H_pad + H_pad + H_pad * O_pad + O_pad)

    out = pl.pallas_call(
        _cnn_kernel,
        out_shape=jax.ShapeDtypeStruct((B, O_pad), jnp.float32),
        grid=grid,
        in_specs=[
            pl.BlockSpec((TB, C), lambda i: (i, 0)),          # x rows
            pl.BlockSpec((C, H_pad), lambda i: (0, 0)),       # conv weight (replicated)
            pl.BlockSpec((1, H_pad), lambda i: (0, 0)),       # conv bias
            pl.BlockSpec((H_pad, O_pad), lambda i: (0, 0)),   # fused linear weight
            pl.BlockSpec((1, O_pad), lambda i: (0, 0)),       # fused linear bias
        ],
        out_specs=pl.BlockSpec((TB, O_pad), lambda i: (i, 0)),
        compiler_params=pltpu.CompilerParams(
            dimension_semantics=("parallel",)),
        cost_estimate=pl.CostEstimate(
            flops=flops, transcendentals=0, bytes_accessed=bytes_accessed),
    )(x2d, wc_t, bc_r, w12_p, b12_p)

    return out[:, :out_size]


def cnn_forward(x, prepared):
    """x: (B, input_size, 1) float32, NCL layout like the PyTorch Conv1d."""
    assert x.ndim == 3 and x.shape[2] == 1, \
        "Flatten->Linear(hidden_dim,.) requires L == 1"
    wc_t, bc_r, w12_p, b12_p, out_size = prepared
    return _forward_impl(x, wc_t, bc_r, w12_p, b12_p, out_size=out_size)


def init_params(key, input_size, hidden_dim, output_size):
    """Deterministic PyTorch-style uniform(-1/sqrt(fan_in), 1/sqrt(fan_in)) init."""
    ks = jax.random.split(key, 6)

    def u(k, shape, fan_in):
        bound = 1.0 / jnp.sqrt(jnp.float32(fan_in))
        return jax.random.uniform(k, shape, jnp.float32, -bound, bound)

    wc = u(ks[0], (hidden_dim, input_size, 1), input_size)   # Conv1d weight
    bc = u(ks[1], (hidden_dim,), input_size)                 # Conv1d bias
    w1 = u(ks[2], (10, hidden_dim), hidden_dim)              # Linear(hidden_dim, 10)
    b1 = u(ks[3], (10,), hidden_dim)
    w2 = u(ks[4], (output_size, 10), 10)                     # Linear(10, output_size)
    b2 = u(ks[5], (output_size,), 10)
    return (wc, bc, w1, b1, w2, b2)


def _reference(x, params):
    """Unfused reference matching the PyTorch module exactly."""
    wc, bc, w1, b1, w2, b2 = params
    h = jnp.einsum('bcl,hcl->bh', x, wc) + bc[None, :]
    h = h * h
    z = h @ w1.T + b1[None, :]
    return z @ w2.T + b2[None, :]


if __name__ == "__main__":
    input_size, hidden_dim, output_size = 4, 32, 3
    key = jax.random.PRNGKey(0)
    kx, kx2, kp = jax.random.split(key, 3)

    params = init_params(kp, input_size, hidden_dim, output_size)
    prepared = prepare_params(params)          # one-time weight preprocessing

    # Small canonical case.
    B = 8
    x = jax.random.normal(kx, (B, input_size, 1), jnp.float32)   # NCL, L=1
    out = jax.block_until_ready(cnn_forward(x, prepared))
    ref = _reference(x, params)
    assert out.shape == (B, output_size)
    # Linear-Linear folding is algebraically exact; f32 rounding differs ~1e-6.
    assert jnp.allclose(out, ref, atol=5e-5, rtol=5e-5)

    # Ragged-grid case (B % TB != 0): confirms out-of-bounds rows of the last
    # partial block are dropped and never leak into the sliced output.
    B2 = 37
    x2 = jax.random.normal(kx2, (B2, input_size, 1), jnp.float32)
    out2 = jax.block_until_ready(cnn_forward(x2, prepared))
    ref2 = _reference(x2, params)
    assert out2.shape == (B2, output_size)
    assert jnp.allclose(out2, ref2, atol=5e-5, rtol=5e-5)

    print("KERNEL_OK")
</pallas_src>

<mosaic_0001>
module attributes {stable_mosaic.version = 11 : i64} {
  func.func @_cnn_kernel(%arg0: i32, %arg1: memref<8x4xf32, #tpu.memory_space<vmem>>, %arg2: memref<4x128xf32, #tpu.memory_space<vmem>>, %arg3: memref<1x128xf32, #tpu.memory_space<vmem>>, %arg4: memref<128x8xf32, #tpu.memory_space<vmem>>, %arg5: memref<1x8xf32, #tpu.memory_space<vmem>>, %arg6: memref<8x8xf32, #tpu.memory_space<vmem>>) attributes {dimension_semantics = [#tpu.dimension_semantics<parallel>], iteration_bounds = array<i64: 1>, scalar_prefetch = 0 : i64, scratch_operands = 0 : i64, tpu.core_type = #tpu.core_type<tc>, window_params = [{transform_indices = @transform_0, window_bounds = array<i64: 8, 4>}, {pipeline_mode = #tpu.pipeline_mode<synchronous>, transform_indices = @transform_1, window_bounds = array<i64: 4, 128>}, {pipeline_mode = #tpu.pipeline_mode<synchronous>, transform_indices = @transform_2, window_bounds = array<i64: 1, 128>}, {pipeline_mode = #tpu.pipeline_mode<synchronous>, transform_indices = @transform_3, window_bounds = array<i64: 128, 8>}, {pipeline_mode = #tpu.pipeline_mode<synchronous>, transform_indices = @transform_4, window_bounds = array<i64: 1, 8>}, {transform_indices = @transform_5, window_bounds = array<i64: 8, 8>}]} {
    %c0 = arith.constant 0 : index
    %c0_0 = arith.constant 0 : index
    %0 = vector.load %arg1[%c0, %c0_0] : memref<8x4xf32, #tpu.memory_space<vmem>>, vector<8x4xf32>
    %c0_1 = arith.constant 0 : index
    %c0_2 = arith.constant 0 : index
    %1 = vector.load %arg2[%c0_1, %c0_2] : memref<4x128xf32, #tpu.memory_space<vmem>>, vector<4x128xf32>
    %cst = arith.constant dense<0.000000e+00> : vector<8x128xf32>
    %2 = tpu.matmul %0, %1, %cst {dimension_numbers = #tpu.dot_dimension_numbers<[1], [0], [0], [1], [0, 0, 1, 1], [], []>} : vector<8x4xf32>, vector<4x128xf32>, vector<8x128xf32> -> vector<8x128xf32>
    %c0_3 = arith.constant 0 : index
    %c0_4 = arith.constant 0 : index
    %3 = vector.load %arg3[%c0_3, %c0_4] : memref<1x128xf32, #tpu.memory_space<vmem>>, vector<1x128xf32>
    %4 = vector.broadcast %3 : vector<1x128xf32> to vector<8x128xf32>
    %5 = arith.addf %2, %4 : vector<8x128xf32>
    %6 = arith.mulf %5, %5 : vector<8x128xf32>
    %c0_5 = arith.constant 0 : index
    %c0_6 = arith.constant 0 : index
    %7 = vector.load %arg4[%c0_5, %c0_6] : memref<128x8xf32, #tpu.memory_space<vmem>>, vector<128x8xf32>
    %cst_7 = arith.constant dense<0.000000e+00> : vector<8x8xf32>
    %8 = tpu.matmul %6, %7, %cst_7 {dimension_numbers = #tpu.dot_dimension_numbers<[1], [0], [0], [1], [0, 0, 1, 1], [], []>} : vector<8x128xf32>, vector<128x8xf32>, vector<8x8xf32> -> vector<8x8xf32>
    %c0_8 = arith.constant 0 : index
    %c0_9 = arith.constant 0 : index
    %9 = vector.load %arg5[%c0_8, %c0_9] : memref<1x8xf32, #tpu.memory_space<vmem>>, vector<1x8xf32>
    %10 = vector.broadcast %9 : vector<1x8xf32> to vector<8x8xf32>
    %11 = arith.addf %8, %10 : vector<8x8xf32>
    %c0_10 = arith.constant 0 : index
    %c0_11 = arith.constant 0 : index
    %12 = vector.load %arg6[%c0_10, %c0_11] : memref<8x8xf32, #tpu.memory_space<vmem>>, vector<8x8xf32>
    tpu.vector_store %arg6[%c0_10, %c0_11], %11 {strides = array<i32>} : memref<8x8xf32, #tpu.memory_space<vmem>>, vector<8x8xf32>,
    return
  }
  func.func @transform_0(%arg0: i32) -> (i32, i32) {
    %c0_i32 = arith.constant 0 : i32
    %c0_i32_0 = arith.constant 0 : i32
    return %arg0, %c0_i32 : i32, i32
  }
  func.func @transform_1(%arg0: i32) -> (i32, i32) {
    %c0_i32 = arith.constant 0 : i32
    %c0_i32_0 = arith.constant 0 : i32
    %c0_i32_1 = arith.constant 0 : i32
    return %c0_i32, %c0_i32_0 : i32, i32
  }
  func.func @transform_2(%arg0: i32) -> (i32, i32) {
    %c0_i32 = arith.constant 0 : i32
    %c0_i32_0 = arith.constant 0 : i32
    %c0_i32_1 = arith.constant 0 : i32
    return %c0_i32, %c0_i32_0 : i32, i32
  }
  func.func @transform_3(%arg0: i32) -> (i32, i32) {
    %c0_i32 = arith.constant 0 : i32
    %c0_i32_0 = arith.constant 0 : i32
    %c0_i32_1 = arith.constant 0 : i32
    return %c0_i32, %c0_i32_0 : i32, i32
  }
  func.func @transform_4(%arg0: i32) -> (i32, i32) {
    %c0_i32 = arith.constant 0 : i32
    %c0_i32_0 = arith.constant 0 : i32
    %c0_i32_1 = arith.constant 0 : i32
    return %c0_i32, %c0_i32_0 : i32, i32
  }
  func.func @transform_5(%arg0: i32) -> (i32, i32) {
    %c0_i32 = arith.constant 0 : i32
    %c0_i32_0 = arith.constant 0 : i32
    return %arg0, %c0_i32 : i32, i32
  }
}

</mosaic_0001>

<bundles_post_ra>
// kernel: _forward_impl.1
= control target key start
LH: loop header
LB: loop body
LE: loop exit
PB: predicated region body
PF: predicated region fallthrough
CT: control target
= control target key end

     0   :  { %vm30_vm0 = vcmask 1043456   ;;  %vm26_vm1 = vcmask 31744   ;;  %vm95_vm2 = vcmask 64512   ;;  %s198_s1 = inlined_call_operand.vmem [shape: f32[4,128], index: 1, kind: input, shape index: {}]   ;;  %s199_s0 = inlined_call_operand.vmem [shape: f32[8,4], index: 0, kind: input, shape index: {}]   ;;  %s200_s3 = inlined_call_operand.vmem [shape: f32[128,8], index: 3, kind: input, shape index: {}]   ;;  %s201_s2 = inlined_call_operand.vmem [shape: f32[1,128], index: 2, kind: input, shape index: {}]   ;;  %s202_s4 = inlined_call_operand.vmem [shape: f32[1,8], index: 4, kind: input, shape index: {}]   ;;  %s203_s5 = inlined_call_operand.vmem [shape: f32[8,8], index: 5, kind: output, shape index: {}]  }
   0x1   :  { %v21_v0 = vld [vmem:[%s198_s1] sm:$0xf]  ;;  %v70_v2 = vld [vmem:[%s200_s3 + $0x78] sm:$0xff]  ;;  %v69_v3 = vld [vmem:[%s200_s3 + $0x70] sm:$0xff] }
   0x2   :  { %v20_v1 = vld [vmem:[%s199_s0] sm:$0xff]  ;;  %101 = vmatpush.msk.msra.mxu0 %vm30_vm0, %v21_v0  ;;  %75 = vmatpush.msra.mxu1 %v70_v2  ;;  %v68_v4 = vld [vmem:[%s200_s3 + $0x68] sm:$0xff]  ;;  %v66_v6 = vld [vmem:[%s200_s3 + $0x58] sm:$0xff] }
   0x3   :  { %102 = vmatmul.msk.f32.vlgmr.msra.gmra.mxu0 %vm26_vm1, %v20_v1  ;;  %v67_v5 = vld [vmem:[%s200_s3 + $0x60] sm:$0xff]  ;;  %v65_v7 = vld [vmem:[%s200_s3 + $0x50] sm:$0xff]  ;;  %v64_v8 = vld [vmem:[%s200_s3 + $0x48] sm:$0xff] }
   0x4   :  { %76 = vmatpush.msra.mxu1 %v69_v3  ;;  %v63_v9 = vld [vmem:[%s200_s3 + $0x40] sm:$0xff]  ;;  %v62_v10 = vld [vmem:[%s200_s3 + $0x38] sm:$0xff]  ;;  %v61_v11 = vld [vmem:[%s200_s3 + $0x30] sm:$0xff] }
   0x5   :  { %v60_v12 = vld [vmem:[%s200_s3 + $0x28] sm:$0xff]  ;;  %v59_v13 = vld [vmem:[%s200_s3 + $0x20] sm:$0xff]  ;;  %v58_v14 = vld [vmem:[%s200_s3 + $0x18] sm:$0xff] }
   0x6   :  { %77 = vmatpush.msra.mxu1 %v68_v4  ;;  %v57_v15 = vld [vmem:[%s200_s3 + $0x10] sm:$0xff]  ;;  %v56_v16 = vld [vmem:[%s200_s3 + $0x8] sm:$0xff]  ;;  %v55_v17 = vld [vmem:[%s200_s3] sm:$0xff] }
   0x7   :  { %v103_v18 = vld [vmem:[%s201_s2] ss:$0 sm:$0xff] }
   0x8   :  { %78 = vmatpush.msra.mxu1 %v67_v5  ;;  %v104_v22 = vld [vmem:[%s202_s4] ss:$0 sm:$0xff] }
   0xa   :  { %79 = vmatpush.msra.mxu1 %v66_v6 }
   0xc   :  { %80 = vmatpush.msra.mxu1 %v65_v7 }
   0xe   :  { %81 = vmatpush.msra.mxu1 %v64_v8 }
  0x10   :  { %82 = vmatpush.msra.mxu1 %v63_v9 }
  0x12   :  { %83 = vmatpush.msra.mxu1 %v62_v10 }
  0x14   :  { %84 = vmatpush.msra.mxu1 %v61_v11 }
  0x16   :  { %85 = vmatpush.msra.mxu1 %v60_v12 }
  0x18   :  { %86 = vmatpush.msra.mxu1 %v59_v13 }
  0x1a   :  { %87 = vmatpush.msra.mxu1 %v58_v14 }
  0x1c   :  { %88 = vmatpush.msra.mxu1 %v57_v15 }
  0x1e   :  { %89 = vmatpush.msra.mxu1 %v56_v16 }
  0x20   :  { %90 = vmatpush.msra.mxu1 %v55_v17 }
  0x80   :  { %v51_v19 = vpop.f32.mrf.mxu0 }
  0x81   :  { %v52_v20 = vadd.f32 %v103_v18, %v51_v19 }
  0x83   :  { %v54_v21 = vmul.f32 %v52_v20, %v52_v20 }
  0x85   :  { %91 = vmatmul.f32.vlgmr.msra.gmra.mxu1 %v54_v21 }
 0x102   :  { %v92_v23 = vpop.f32.mrf.mxu1 }
 0x103   :  { %v93_v24 = vadd.f32 %v104_v22, %v92_v23 }
 0x105   :  { %96 = vst.msk [vmem:[%s203_s5] sm:$0xff] %vm95_vm2, %v93_v24 }

</bundles_post_ra>
